<compile_context>
chip_gen: v7x
topology: tpu7x:2x2x1
jax: 0.10.0
libtpu: 0.0.40
codegen_flags: <defaults>
</compile_context>

<pallas_src>
import math

import jax
import jax.numpy as jnp
from jax.experimental import pallas as pl
from jax.experimental.pallas import tpu as pltpu

LEAK = 0.1
CLAMP_LO, CLAMP_HI = -5.0, 5.0
HIDDEN = 100          # logical width (PyTorch module)
HIDDEN_PAD = 128      # lane-dense padded width used inside the kernel


def _round_up(x, m):
    return ((x + m - 1) // m) * m


def _cdiv(a, b):
    return (a + b - 1) // b


def _leaky_relu(x, leak):
    # For 0 < leak < 1, max(x, leak*x) == LeakyReLU(x): mul+max (2 VALU ops).
    return jnp.maximum(x, leak * x)


# ----------------------------------------------------------------------------
# Kernel
# ----------------------------------------------------------------------------
def prednet_kernel(obs_ref, w1_ref, b1_ref, w2_ref, b2_ref, w3_ref, b3_ref,
                   out_ref):
    # Clamp observations (STANDARDIZED_OB_CLAMPS) in f32.
    x = jnp.clip(obs_ref[...].astype(jnp.float32), CLAMP_LO, CLAMP_HI)

    # fc_block_1: Linear(ob_dim, 128pad) + LeakyReLU(0.1).  W1 is f32 by
    # default (fidelity for arbitrary ob_dim); f32 accumulation regardless.
    h = jnp.dot(x.astype(w1_ref.dtype), w1_ref[...],
                preferred_element_type=jnp.float32)
    h = _leaky_relu(h + b1_ref[...], LEAK)

    # fc_block_2: Linear(128pad, 128pad) + LeakyReLU(0.1)  (bf16 MXU inputs).
    h = jnp.dot(h.astype(w2_ref.dtype), w2_ref[...],
                preferred_element_type=jnp.float32)
    h = _leaky_relu(h + b2_ref[...], LEAK)

    # fc_block_3: Linear(128pad, 128pad) + LeakyReLU(0.1)  (bf16 MXU inputs).
    h = jnp.dot(h.astype(w3_ref.dtype), w3_ref[...],
                preferred_element_type=jnp.float32)
    h = _leaky_relu(h + b3_ref[...], LEAK)

    out_ref[...] = h.astype(out_ref.dtype)


# ----------------------------------------------------------------------------
# Param prep (run once, outside the per-call path)
# ----------------------------------------------------------------------------
def prepare_params(params, *, first_layer_dtype=jnp.float32,
                   hidden_dtype=jnp.bfloat16):
    """Pad hidden width 100 -> 128 with zeros (exact) and cast, once."""
    def pad2(a, rows_to, cols_to, dtype):
        r, c = a.shape
        return jnp.pad(a, ((0, rows_to - r), (0, cols_to - c))).astype(dtype)

    ob_dim = params["W1"].shape[0]
    return {
        "W1": pad2(params["W1"], ob_dim, HIDDEN_PAD, first_layer_dtype),
        "b1": pad2(params["b1"], 1, HIDDEN_PAD, jnp.float32),
        "W2": pad2(params["W2"], HIDDEN_PAD, HIDDEN_PAD, hidden_dtype),
        "b2": pad2(params["b2"], 1, HIDDEN_PAD, jnp.float32),
        "W3": pad2(params["W3"], HIDDEN_PAD, HIDDEN_PAD, hidden_dtype),
        "b3": pad2(params["b3"], 1, HIDDEN_PAD, jnp.float32),
    }


# ----------------------------------------------------------------------------
# Tile / VMEM planning
# ----------------------------------------------------------------------------
def _pick_tile(B, ob_dim, out_itemsize, w_bytes, block_b):
    """Pick a batch tile TB (multiple of 8) and an explicit VMEM limit."""
    # Per-row VMEM footprint of one grid step: double-buffered streamed blocks
    # plus generous headroom for live f32 intermediates and bf16 casts.
    per_row = (2 * ob_dim * 4                       # obs block (2x buffered, f32)
               + 2 * HIDDEN_PAD * out_itemsize      # out block (2x buffered)
               + ob_dim * 4 + ob_dim * 2            # clamped obs + bf16 cast
               + 4 * HIDDEN_PAD * 4                 # live f32 hidden tiles
               + 2 * HIDDEN_PAD * 2)                # bf16 hidden casts

    try:
        phys = int(getattr(pltpu.get_tpu_info(), "vmem_capacity_bytes", 0)) \
            or (64 << 20)
    except Exception:  # pragma: no cover - conservative fallback
        phys = 64 << 20   # v7x per-TensorCore VMEM

    # Working-set budget for streamed blocks + scratch: half of physical VMEM,
    # capped at 40 MiB (keeps headroom on 64 MiB v7x, fits easily on 128 MiB).
    budget = min(phys // 2, 40 << 20)
    tb_cap = (budget - 2 * w_bytes) // per_row      # weights are double-buffered
    tb_cap = max(8, (tb_cap // 8) * 8)

    B8 = _round_up(B, 8)
    tb = min(int(block_b), tb_cap, B8)
    tb = max(8, (tb // 8) * 8)                      # (8,128) lowering constraint

    # Megacore (v7x): keep the batch grid >= 4 steps when that still leaves
    # >= ~2048-row tiles; no-op / harmless on single-TC v5e/v6e.
    if _cdiv(B8, tb) < 4 and B8 >= 4 * 2048:
        tb = min(tb, _round_up(_cdiv(B8, 4), 8))
        tb = max(8, (tb // 8) * 8)

    est = per_row * tb + 2 * w_bytes + (8 << 20)
    vmem_limit = int(min(phys * 3 // 4, max(32 << 20, est)))
    return tb, vmem_limit


# ----------------------------------------------------------------------------
# Forward wrapper
# ----------------------------------------------------------------------------
def prednet_forward(obs, prepared, *, block_b=8192, out_dtype=jnp.float32,
                    trim=True):
    """obs: [B, ob_dim] float32; prepared: output of prepare_params().

    Returns [B, 100] (trim=True) or the padded lane-dense [B, 128]
    (trim=False; preferred when the downstream consumer can fuse the slice).
    """
    B, ob_dim = obs.shape
    HP = HIDDEN_PAD
    w1, b1 = prepared["W1"], prepared["b1"]
    w2, b2 = prepared["W2"], prepared["b2"]
    w3, b3 = prepared["W3"], prepared["b3"]
    assert w1.shape == (ob_dim, HP), (w1.shape, ob_dim)

    out_itemsize = jnp.dtype(out_dtype).itemsize
    w_bytes = sum(int(a.size) * a.dtype.itemsize
                  for a in (w1, b1, w2, b2, w3, b3))
    TB, vmem_limit = _pick_tile(B, ob_dim, out_itemsize, w_bytes, block_b)

    # No row padding of obs: partial last tile (if any) is handled by Pallas
    # (out-of-bounds output rows are masked on write).
    grid = (_cdiv(B, TB),)

    resident = lambda shape: pl.BlockSpec(shape, lambda i: (0, 0))

    flops = 2 * B * (ob_dim * HP + 2 * HP * HP)
    bytes_accessed = B * ob_dim * 4 + B * HP * out_itemsize + w_bytes

    out = pl.pallas_call(
        prednet_kernel,
        out_shape=jax.ShapeDtypeStruct((B, HP), out_dtype),
        grid=grid,
        in_specs=[
            pl.BlockSpec((TB, ob_dim), lambda i: (i, 0)),
            resident(w1.shape), resident(b1.shape),
            resident(w2.shape), resident(b2.shape),
            resident(w3.shape), resident(b3.shape),
        ],
        out_specs=pl.BlockSpec((TB, HP), lambda i: (i, 0)),
        compiler_params=pltpu.CompilerParams(
            dimension_semantics=("parallel",),
            vmem_limit_bytes=vmem_limit),
        cost_estimate=pl.CostEstimate(
            flops=flops, transcendentals=0, bytes_accessed=bytes_accessed),
    )(obs, w1, b1, w2, b2, w3, b3)

    if trim:
        return out[:, :HIDDEN]   # column slice only; no row-padding slice
    return out


# ----------------------------------------------------------------------------
# Synthetic init + pure-JAX reference
# ----------------------------------------------------------------------------
def init_params(key, ob_dim):
    """Deterministic synthetic init mimicking nn.Linear shapes with the
    weight_scale = sqrt(2)/sqrt(1 + leak^2) scaling from the module."""
    scale = math.sqrt(2.0) / math.sqrt(1.0 + LEAK ** 2)
    k1, k2, k3 = jax.random.split(key, 3)

    def linear(k, fan_in, fan_out):
        std = scale / math.sqrt(fan_in)
        w = std * jax.random.normal(k, (fan_in, fan_out), dtype=jnp.float32)
        b = jnp.zeros((1, fan_out), dtype=jnp.float32)  # keep 2D for TPU
        return w, b

    w1, b1 = linear(k1, ob_dim, HIDDEN)
    w2, b2 = linear(k2, HIDDEN, HIDDEN)
    w3, b3 = linear(k3, HIDDEN, HIDDEN)
    return {"W1": w1, "b1": b1, "W2": w2, "b2": b2, "W3": w3, "b3": b3}


def prednet_reference(obs, params):
    """Pure-JAX f32 reference of the same forward pass (correctness check)."""
    x = jnp.clip(obs, CLAMP_LO, CLAMP_HI)
    x = _leaky_relu(x @ params["W1"] + params["b1"], LEAK)
    x = _leaky_relu(x @ params["W2"] + params["b2"], LEAK)
    x = _leaky_relu(x @ params["W3"] + params["b3"], LEAK)
    return x


if __name__ == "__main__":
    key = jax.random.PRNGKey(0)
    k_obs, k_params = jax.random.split(key)

    # Small shapes consistent with a 1-D observation space; block_b=32 so the
    # batch grid has multiple steps (exercises tiling + pipelining).
    B, OB_DIM = 64, 16
    obs = 3.0 * jax.random.normal(k_obs, (B, OB_DIM), dtype=jnp.float32)
    params = init_params(k_params, OB_DIM)
    prepared = prepare_params(params)          # pad + cast once

    out = prednet_forward(obs, prepared, block_b=32)
    out = jax.block_until_ready(out)

    ref = prednet_reference(obs, params)
    assert out.shape == (B, HIDDEN), out.shape
    # Layers 2/3 use bf16 MXU inputs with f32 accumulation: loosened tolerance.
    assert jnp.allclose(out, ref, atol=5e-2, rtol=5e-2), (
        "mismatch vs reference; max abs err = "
        f"{float(jnp.max(jnp.abs(out - ref)))}")

    print("KERNEL_OK")
</pallas_src>

<mosaic_0001>
module attributes {stable_mosaic.version = 11 : i64} {
  func.func @prednet_kernel(%arg0: i32, %arg1: memref<32x16xf32, #tpu.memory_space<vmem>>, %arg2: memref<16x128xf32, #tpu.memory_space<vmem>>, %arg3: memref<1x128xf32, #tpu.memory_space<vmem>>, %arg4: memref<128x128xbf16, #tpu.memory_space<vmem>>, %arg5: memref<1x128xf32, #tpu.memory_space<vmem>>, %arg6: memref<128x128xbf16, #tpu.memory_space<vmem>>, %arg7: memref<1x128xf32, #tpu.memory_space<vmem>>, %arg8: memref<32x128xf32, #tpu.memory_space<vmem>>) attributes {dimension_semantics = [#tpu.dimension_semantics<parallel>], iteration_bounds = array<i64: 2>, scalar_prefetch = 0 : i64, scratch_operands = 0 : i64, tpu.core_type = #tpu.core_type<tc>, window_params = [{transform_indices = @transform_0, window_bounds = array<i64: 32, 16>}, {pipeline_mode = #tpu.pipeline_mode<synchronous>, transform_indices = @transform_1, window_bounds = array<i64: 16, 128>}, {pipeline_mode = #tpu.pipeline_mode<synchronous>, transform_indices = @transform_2, window_bounds = array<i64: 1, 128>}, {pipeline_mode = #tpu.pipeline_mode<synchronous>, transform_indices = @transform_3, window_bounds = array<i64: 128, 128>}, {pipeline_mode = #tpu.pipeline_mode<synchronous>, transform_indices = @transform_4, window_bounds = array<i64: 1, 128>}, {pipeline_mode = #tpu.pipeline_mode<synchronous>, transform_indices = @transform_5, window_bounds = array<i64: 128, 128>}, {pipeline_mode = #tpu.pipeline_mode<synchronous>, transform_indices = @transform_6, window_bounds = array<i64: 1, 128>}, {transform_indices = @transform_7, window_bounds = array<i64: 32, 128>}]} {
    %c0 = arith.constant 0 : index
    %c0_0 = arith.constant 0 : index
    %0 = vector.load %arg1[%c0, %c0_0] : memref<32x16xf32, #tpu.memory_space<vmem>>, vector<32x16xf32>
    %cst = arith.constant -5.000000e+00 : f32
    %cst_1 = arith.constant 5.000000e+00 : f32
    %1 = vector.broadcast %cst : f32 to vector<32x16xf32>
    %2 = arith.maximumf %1, %0 : vector<32x16xf32>
    %3 = vector.broadcast %cst_1 : f32 to vector<32x16xf32>
    %4 = arith.minimumf %3, %2 : vector<32x16xf32>
    %c0_2 = arith.constant 0 : index
    %c0_3 = arith.constant 0 : index
    %5 = vector.load %arg2[%c0_2, %c0_3] : memref<16x128xf32, #tpu.memory_space<vmem>>, vector<16x128xf32>
    %cst_4 = arith.constant dense<0.000000e+00> : vector<32x128xf32>
    %6 = tpu.matmul %4, %5, %cst_4 {dimension_numbers = #tpu.dot_dimension_numbers<[1], [0], [0], [1], [0, 0, 1, 1], [], []>} : vector<32x16xf32>, vector<16x128xf32>, vector<32x128xf32> -> vector<32x128xf32>
    %c0_5 = arith.constant 0 : index
    %c0_6 = arith.constant 0 : index
    %7 = vector.load %arg3[%c0_5, %c0_6] : memref<1x128xf32, #tpu.memory_space<vmem>>, vector<1x128xf32>
    %8 = vector.broadcast %7 : vector<1x128xf32> to vector<32x128xf32>
    %9 = arith.addf %6, %8 : vector<32x128xf32>
    %cst_7 = arith.constant 1.000000e-01 : f32
    %10 = vector.broadcast %cst_7 : f32 to vector<32x128xf32>
    %11 = arith.mulf %10, %9 : vector<32x128xf32>
    %12 = arith.maximumf %9, %11 : vector<32x128xf32>
    %13 = arith.truncf %12 : vector<32x128xf32> to vector<32x128xbf16>
    %c0_8 = arith.constant 0 : index
    %c0_9 = arith.constant 0 : index
    %14 = vector.load %arg4[%c0_8, %c0_9] : memref<128x128xbf16, #tpu.memory_space<vmem>>, vector<128x128xbf16>
    %cst_10 = arith.constant dense<0.000000e+00> : vector<32x128xf32>
    %15 = tpu.matmul %13, %14, %cst_10 {dimension_numbers = #tpu.dot_dimension_numbers<[1], [0], [0], [1], [0, 0, 1, 1], [], []>} : vector<32x128xbf16>, vector<128x128xbf16>, vector<32x128xf32> -> vector<32x128xf32>
    %c0_11 = arith.constant 0 : index
    %c0_12 = arith.constant 0 : index
    %16 = vector.load %arg5[%c0_11, %c0_12] : memref<1x128xf32, #tpu.memory_space<vmem>>, vector<1x128xf32>
    %17 = vector.broadcast %16 : vector<1x128xf32> to vector<32x128xf32>
    %18 = arith.addf %15, %17 : vector<32x128xf32>
    %cst_13 = arith.constant 1.000000e-01 : f32
    %19 = vector.broadcast %cst_13 : f32 to vector<32x128xf32>
    %20 = arith.mulf %19, %18 : vector<32x128xf32>
    %21 = arith.maximumf %18, %20 : vector<32x128xf32>
    %22 = arith.truncf %21 : vector<32x128xf32> to vector<32x128xbf16>
    %c0_14 = arith.constant 0 : index
    %c0_15 = arith.constant 0 : index
    %23 = vector.load %arg6[%c0_14, %c0_15] : memref<128x128xbf16, #tpu.memory_space<vmem>>, vector<128x128xbf16>
    %cst_16 = arith.constant dense<0.000000e+00> : vector<32x128xf32>
    %24 = tpu.matmul %22, %23, %cst_16 {dimension_numbers = #tpu.dot_dimension_numbers<[1], [0], [0], [1], [0, 0, 1, 1], [], []>} : vector<32x128xbf16>, vector<128x128xbf16>, vector<32x128xf32> -> vector<32x128xf32>
    %c0_17 = arith.constant 0 : index
    %c0_18 = arith.constant 0 : index
    %25 = vector.load %arg7[%c0_17, %c0_18] : memref<1x128xf32, #tpu.memory_space<vmem>>, vector<1x128xf32>
    %26 = vector.broadcast %25 : vector<1x128xf32> to vector<32x128xf32>
    %27 = arith.addf %24, %26 : vector<32x128xf32>
    %cst_19 = arith.constant 1.000000e-01 : f32
    %28 = vector.broadcast %cst_19 : f32 to vector<32x128xf32>
    %29 = arith.mulf %28, %27 : vector<32x128xf32>
    %30 = arith.maximumf %27, %29 : vector<32x128xf32>
    %c0_20 = arith.constant 0 : index
    %c0_21 = arith.constant 0 : index
    %31 = vector.load %arg8[%c0_20, %c0_21] : memref<32x128xf32, #tpu.memory_space<vmem>>, vector<32x128xf32>
    tpu.vector_store %arg8[%c0_20, %c0_21], %30 {strides = array<i32>} : memref<32x128xf32, #tpu.memory_space<vmem>>, vector<32x128xf32>,
    return
  }
  func.func @transform_0(%arg0: i32) -> (i32, i32) {
    %c0_i32 = arith.constant 0 : i32
    %c0_i32_0 = arith.constant 0 : i32
    return %arg0, %c0_i32 : i32, i32
  }
  func.func @transform_1(%arg0: i32) -> (i32, i32) {
    %c0_i32 = arith.constant 0 : i32
    %c0_i32_0 = arith.constant 0 : i32
    %c0_i32_1 = arith.constant 0 : i32
    return %c0_i32, %c0_i32_0 : i32, i32
  }
  func.func @transform_2(%arg0: i32) -> (i32, i32) {
    %c0_i32 = arith.constant 0 : i32
    %c0_i32_0 = arith.constant 0 : i32
    %c0_i32_1 = arith.constant 0 : i32
    return %c0_i32, %c0_i32_0 : i32, i32
  }
  func.func @transform_3(%arg0: i32) -> (i32, i32) {
    %c0_i32 = arith.constant 0 : i32
    %c0_i32_0 = arith.constant 0 : i32
    %c0_i32_1 = arith.constant 0 : i32
    return %c0_i32, %c0_i32_0 : i32, i32
  }
  func.func @transform_4(%arg0: i32) -> (i32, i32) {
    %c0_i32 = arith.constant 0 : i32
    %c0_i32_0 = arith.constant 0 : i32
    %c0_i32_1 = arith.constant 0 : i32
    return %c0_i32, %c0_i32_0 : i32, i32
  }
  func.func @transform_5(%arg0: i32) -> (i32, i32) {
    %c0_i32 = arith.constant 0 : i32
    %c0_i32_0 = arith.constant 0 : i32
    %c0_i32_1 = arith.constant 0 : i32
    return %c0_i32, %c0_i32_0 : i32, i32
  }
  func.func @transform_6(%arg0: i32) -> (i32, i32) {
    %c0_i32 = arith.constant 0 : i32
    %c0_i32_0 = arith.constant 0 : i32
    %c0_i32_1 = arith.constant 0 : i32
    return %c0_i32, %c0_i32_0 : i32, i32
  }
  func.func @transform_7(%arg0: i32) -> (i32, i32) {
    %c0_i32 = arith.constant 0 : i32
    %c0_i32_0 = arith.constant 0 : i32
    return %arg0, %c0_i32 : i32, i32
  }
}

</mosaic_0001>

<bundles_post_ra>
// kernel: tpu_custom_call.1
= control target key start
LH: loop header
LB: loop body
LE: loop exit
PB: predicated region body
PF: predicated region fallthrough
CT: control target
= control target key end

     0   :  { %12 = vsyncpa [#allocation3], 0  ;;  %s1289_s0 = inlined_call_operand.vmem [shape: f32[64,16], index: 0, kind: input, shape index: {}]   ;;  %s1290_s1 = inlined_call_operand.vmem [shape: f32[16,128], index: 1, kind: input, shape index: {}]   ;;  %s1291_s2 = inlined_call_operand.vmem [shape: f32[1,128], index: 2, kind: input, shape index: {}]   ;;  %s1292_s3 = inlined_call_operand.vmem [shape: bf16[128,128], index: 3, kind: input, shape index: {}]   ;;  %s1293_s4 = inlined_call_operand.vmem [shape: f32[1,128], index: 4, kind: input, shape index: {}]   ;;  %s1294_s5 = inlined_call_operand.hbm [shape: bf16[128,128], index: 5, kind: input, shape index: {}]   ;;  %s1295_s6 = inlined_call_operand.vmem [shape: f32[1,128], index: 6, kind: input, shape index: {}]   ;;  %s1296_s7 = inlined_call_operand.hbm [shape: f32[64,128], index: 7, kind: output, shape index: {}]  }
   0x1   :  { %13 = vsyncpa [#allocation4], 0 }
   0x2   :  { %15 = vsyncpa [#allocation4 + $0x1], 0  ;;  %s1109_s24 = smov 0   ;;  %s1111_s25 = smov 0  }
   0x3   :  { %s1113_s26 = smov 0   ;;  %s1115_s27 = smov 0  }
   0x4 LB: > { %s1130_s28 = sadd.s32 4294967295, %s1061_s27   ;;  %s775_s29 = sadd.s32 4294967294, %s1061_s27   ;;  %s1061_s27 = sphi %s1115_s27, %s1312_s27   ;;  %s1057_s26 = sphi %s1113_s26, %s1311_s26   ;;  %s1053_s25 = sphi %s1111_s25, %s1310_s25   ;;  %s1049_s24 = sphi %s1109_s24, %s1309_s24  }
   0x5   : > { %s1134_s30 = sadd.s32 1, %s1061_s27   ;;  %s180_s8 = sadd.s32 1, %s1057_s26 }
   0x6   : > { %s177_s9 = ssub.s32 %s1061_s27, %s1134_s30  ;;  %p190_p0 = scmp.ne.s32.totalorder %s1057_s26, %s1053_s25 }
   0x7   : > { %p178_p1 = scmp.eq.s32.totalorder %s177_s9, 0  ;;  %p191_p2 = scmp.eq.s32.totalorder %s1130_s28, 1 }
   0x8   : > { %p196_p3 = scmp.ne.s32.totalorder %s1053_s25, %s1049_s24  ;;  %p197_p4 = scmp.eq.s32.totalorder %s775_s29, 1 }
   0x9   : > { %s1145_s10 = scalar_select %p178_p1, %s1057_s26, %s180_s8  }
   0xa   : > { %p1147_p5 = por %p191_p2, %p190_p0  ;;  %p1151_p6 = por %p197_p4, %p196_p3 }
   0xb   : > { %p776_p7 = scmp.ge.s32.totalorder %s1061_s27, 1  ;;  %p204_p8 = scmp.lt.s32.totalorder %s1061_s27, 3 }
   0xc   : > { %s1300_s11 = scalar_select %p1147_p5, 1, 0 }
   0xd   : > { %s1301_s12 = scalar_select %p1151_p6, 1, 0 }
   0xe   : > { %p1297_p9 = scmp.eq.s32.totalorder %s1130_s28, 0  ;;  %p1158_p10 = pnand %p776_p7, %p204_p8 }
   0xf   : > { %s1063_s14 = smov [#allocation2]   ;;  %s967_s19 = scalar_lea.hbm %s1294_s5, 1024 }
  0x10   : > { %s1302_s13 = scalar_select %p1158_p10, 1, 0 }
  0x11   : > { %s228_s15 = sshll.u32 %s1063_s14, 4  ;;  %p903_p11 = pneg %p1158_p10  ;;  %s229_s15 = int_to_ptr.vmem [resolvable:$true] %s228_s15 }
  0x12   : > { %p968_p13 = scmp.ne.s32.totalorder %s1294_s5, %s967_s19  ;;  %p974_p3 = scmp.lt.u32.totalorder %s967_s19, %s1294_s5 }
  0x13   : > { %p1166_p12 = pnand %p1297_p9, %p903_p11 }
  0x15   : > { %p969_p0 = pneg %p1166_p12 }
  0x17   : > { %p970_p1 = pnand %p969_p0, %p968_p13 }
  0x19   : > { %p971_p2 = pneg %p970_p1 }
  0x1b   : > { %p976_p4 = pnand %p974_p3, %p971_p2 }
  0x1d   : > { %979 = shalt.err (!%p976_p4)
}
  0x1e   : > { %s980_s29 = scalar_lea.vmem %s229_s15, 1024  ;;  %p988_p9 = scmp.lt.s32.totalorder %s229_s15, %s229_s15 }
  0x1f   : > { %p981_p7 = scmp.ne.s32.totalorder %s229_s15, %s980_s29  ;;  %p989_p6 = scmp.lt.s32.totalorder %s980_s29, %s980_s29 }
  0x21   : > { %p983_p8 = pnand %p981_p7, %p969_p0  ;;  %p990_p5 = por %p989_p6, %p988_p9 }
  0x23   : > { %p984_p11 = pneg %p983_p8 }
  0x25   : > { %p991_p10 = pnand %p990_p5, %p984_p11 }
  0x27   : > { %994 = shalt.err (!%p991_p10)
}
  0x28   : > { %s1064_s8 = smov 64   ;;  %s1065_s9 = smov 4  }
  0x29   : > { %906 = dma.hbm_to_vmem [thread:$0]  (!%p1166_p12), %s1294_s5, 1024, %s229_s15, [#allocation3], %s1064_s8, %s1064_s8, %s1065_s9  }
  0x2a   : > { %p1304_p13 = scmp.ne.s32.totalorder %s1302_s13, 0 }
  0x2b   : > { %p1305_p1 = scmp.eq.s32.totalorder (!%p1304_p13), %s1130_s28, 0 }
  0x2c   : > { %256 = sbr.rel (%p1304_p13) target bundleno = 747 (0x2eb), region = 48 }
  0x33   : > { %1040 = dma.done.wait (%p1305_p1), [#allocation3], 1024   ;;  %p1306_p0 = pmov %p1305_p1 }
  0x34   : > { %s782_s18 = sshll.u32 %s1130_s28, 2  ;;  %v308_v0 = vld [vmem:[%s1290_s1] sm:$0xff]  ;;  %v309_v1 = vld [vmem:[%s1290_s1 + $0x8] sm:$0xff]  ;;  %vm317_vm0 = vcmask 130048   ;;  %v953_v12 = vld [vmem:[%s1292_s3 + $0x10] sm:$0xff]   ;;  %s816_s13 = sshll.u32 %s1130_s28, 9 }
  0x35   : > { %1042 = vsyncadd (%p1306_p0), [#allocation3], 4294966272  ;;  %p289_p5 = scmp.lt.s32.totalorder %s782_s18, 7  ;;  %v893_v3 = vpack.c.bf16 %v309_v1, %v308_v0  ;;  %v951_v9 = vld [vmem:[%s1292_s3] sm:$0xff]   ;;  %v952_v11 = vld [vmem:[%s1292_s3 + $0x8] sm:$0xff]   ;;  %s1246_s8 = scalar_lea.hbm %s1296_s7, %s816_s13 }
  0x36   : > { %853 = vmatprep.subr.bf16.mxu1 %v951_v9  ;;  %v954_v14 = vld [vmem:[%s1292_s3 + $0x18] sm:$0xff]   ;;  %v955_v15 = vld [vmem:[%s1292_s3 + $0x20] sm:$0xff]   ;;  %v956_v16 = vld [vmem:[%s1292_s3 + $0x28] sm:$0xff]   ;;  %p1307_p9 = scmp.ne.s32.totalorder %s1300_s11, 0  ;;  %s1066_s14 = smov [#allocation5]  }
  0x37   : > { %s1314_s18 = smov (!%p289_p5, %s782_s18), 7  ;;  %894 = vmatprep.subr.bf16.mxu0 %v893_v3  ;;  %854 = vmatpush3.bf16.msra.mxu1 %v951_v9  ;;  %v957_v17 = vld [vmem:[%s1292_s3 + $0x30] sm:$0xff]   ;;  %v958_v18 = vld [vmem:[%s1292_s3 + $0x38] sm:$0xff]   ;;  %v959_v19 = vld [vmem:[#allocation2] sm:$0xff]   ;;  %s999_s17 = sshll.u32 %s1066_s14, 4  ;;  %s1000_s17 = int_to_ptr.vmem [resolvable:$false] %s999_s17 }
  0x38   : > { %s783_s19 = sshll.u32 %s1314_s18, 3  ;;  %896 = vmatpush3.bf16.msra.mxu0 %v893_v3  ;;  %855 = vmatprep.subr.bf16.mxu1 %v952_v11  ;;  %v960_v20 = vld [vmem:[#allocation2 + $0x8] sm:$0xff]   ;;  %v961_v21 = vld [vmem:[#allocation2 + $0x10] sm:$0xff]   ;;  %v962_v22 = vld [vmem:[#allocation2 + $0x18] sm:$0xff]   ;;  %s1001_s18 = scalar_lea.vmem %s1000_s17, 1024 }
  0x39   : > { %s292_s21 = scalar_lea.vmem %s1289_s0, %s783_s19  ;;  %873 = vmatprep.subr.bf16.mxu0 %v959_v19  ;;  %v963_v23 = vld [vmem:[#allocation2 + $0x20] sm:$0xff]   ;;  %v964_v43 = vld [vmem:[#allocation2 + $0x28] sm:$0xff]   ;;  %v965_v44 = vld [vmem:[#allocation2 + $0x30] sm:$0xff]   ;;  %s285_s19 = sand.u32 1, %s1053_s25  }
  0x3a   : > { %v296_v2 = vld [vmem:[%s292_s21] sm:$0xff]  ;;  %v297_v5 = vld [vmem:[%s292_s21 + $0x8] sm:$0xff]  ;;  %v298_v6 = vld [vmem:[%s292_s21 + $0x10] sm:$0xff]  ;;  %s1248_s28 = scalar_lea.sflag [#allocation4], %s285_s19 }
  0x3b   : > { %v784_v4 = vclamps-f32 %v296_v2, 5.0  ;;  %v785_v7 = vclamps-f32 %v297_v5, 5.0  ;;  %v299_v8 = vld [vmem:[%s292_s21 + $0x18] sm:$0xff]  ;;  %v786_v10 = vclamps-f32 %v298_v6, 5.0  ;;  %856 = vmatpush3.bf16.msra.mxu1 %v952_v11  ;;  %v788_v24 = vld [vmem:[%s1291_s2] ss:$0 sm:$0xff] }
  0x3c   : > { %v787_v13 = vclamps-f32 %v299_v8, 5.0  ;;  %857 = vmatprep.subr.bf16.mxu1 %v953_v12  ;;  %v966_v45 = vld [vmem:[#allocation2 + $0x38] sm:$0xff]   ;;  %v793_v46 = vld [vmem:[%s1293_s4] ss:$0 sm:$0xff]  ;;  %s781_s21 = sshll.u32 %s285_s19, 5 }
  0x3d   : > { %847 = vmatprep.mubr.msk.f32.mxu0 %vm317_vm0, %v784_v4  ;;  %v802_v1 = vld [vmem:[%s1295_s6] ss:$0 sm:$0xff]  ;;  %s287_s22 = scalar_lea.vmem [#allocation5], %s781_s21 }
  0x3e   : > { %848 = vmatmul.mubr.msk.f32.vlgmr.msra.gmra.mrb[0].mxu0 %vm317_vm0, %v785_v7  ;;  %s701_s15 = sshll.u32 %s287_s22, 4  ;;  %s1241_s15 = int_to_ptr.vmem [resolvable:$true] %s701_s15 }
  0x3f   : > { %850 = vmatprep.mubr.msk.f32.mxu0 %vm317_vm0, %v786_v10  ;;  %858 = vmatpush3.bf16.msra.mxu1 %v953_v12  ;;  %s995_s9 = scalar_lea.vmem %s1241_s15, 512  ;;  %p1002_p2 = scmp.lt.s32.totalorder %s1241_s15, %s1000_s17 }
  0x40   : > { %859 = vmatprep.subr.bf16.mxu1 %v954_v14  ;;  %874 = vmatpush3.bf16.msra.mxu0 %v959_v19  ;;  %p996_p6 = scmp.ne.s32.totalorder %s1241_s15, %s995_s9  ;;  %p1003_p3 = scmp.lt.s32.totalorder %s1001_s18, %s995_s9 }
  0x41   : > { %875 = vmatprep.subr.bf16.mxu0 %v960_v20 }
  0x42   : > { %851 = vmatmul.mubr.msk.f32.gmra.mrb[2].mxu0 %vm317_vm0, %v787_v13  ;;  %p997_p10 = pnand %p996_p6, %p1307_p9  ;;  %p1004_p4 = por %p1003_p3, %p1002_p2 }
  0x43   : > { %860 = vmatpush3.bf16.msra.mxu1 %v954_v14 }
  0x44   : > { %861 = vmatprep.subr.bf16.mxu1 %v955_v15  ;;  %876 = vmatpush3.bf16.msra.mxu0 %v960_v20  ;;  %p998_p12 = pneg %p997_p10 }
  0x45   : > { %877 = vmatprep.subr.bf16.mxu0 %v961_v21 }
  0x46   : > { %p1005_p7 = pnand %p1004_p4, %p998_p12 }
  0x47   : > { %862 = vmatpush3.bf16.msra.mxu1 %v955_v15 }
  0x48   : > { %863 = vmatprep.subr.bf16.mxu1 %v956_v16  ;;  %878 = vmatpush3.bf16.msra.mxu0 %v961_v21 }
  0x49   : > { %879 = vmatprep.subr.bf16.mxu0 %v962_v22 }
  0x4b   : > { %864 = vmatpush3.bf16.msra.mxu1 %v956_v16 }
  0x4c   : > { %865 = vmatprep.subr.bf16.mxu1 %v957_v17  ;;  %880 = vmatpush3.bf16.msra.mxu0 %v962_v22 }
  0x4d   : > { %881 = vmatprep.subr.bf16.mxu0 %v963_v23 }
  0x4f   : > { %866 = vmatpush3.bf16.msra.mxu1 %v957_v17 }
  0x50   : > { %867 = vmatprep.subr.bf16.mxu1 %v958_v18  ;;  %882 = vmatpush3.bf16.msra.mxu0 %v963_v23 }
  0x51   : > { %883 = vmatprep.subr.bf16.mxu0 %v964_v43 }
  0x53   : > { %868 = vmatpush3.bf16.msra.mxu1 %v958_v18 }
  0x54   : > { %884 = vmatpush3.bf16.msra.mxu0 %v964_v43 }
  0x55   : > { %885 = vmatprep.subr.bf16.mxu0 %v965_v44 }
  0x58   : > { %886 = vmatpush3.bf16.msra.mxu0 %v965_v44 }
  0x59   : > { %887 = vmatprep.subr.bf16.mxu0 %v966_v45 }
  0x5c   : > { %888 = vmatpush3.bf16.msra.mxu0 %v966_v45 }
 0x111   : > { %v849_v25 = vpop.f32.mrb[0].mxu0 }
 0x112   : > { %v402_v26 = vadd.f32 %v849_v25, %v788_v24  ;;  %v396_v27 = vpop.f32.mrb[1].mxu0 }
 0x113   : > { %v397_v28 = vadd.f32 %v788_v24, %v396_v27 }
 0x114   : > { %v416_v29 = vmul.f32 0.1, %v402_v26 }
 0x115   : > { %v415_v30 = vmul.f32 0.1, %v397_v28  ;;  %v852_v31 = vpop.f32.mrb[2].mxu0 }
 0x116   : > { %v412_v32 = vadd.f32 %v852_v31, %v788_v24  ;;  %v406_v33 = vpop.f32.mrb[3].mxu0  ;;  %v420_v34 = vmax.f32 %v402_v26, %v416_v29 }
 0x117   : > { %v407_v35 = vadd.f32 %v788_v24, %v406_v33  ;;  %v419_v36 = vmax.f32 %v397_v28, %v415_v30 }
 0x118   : > { %v418_v37 = vmul.f32 0.1, %v412_v32 }
 0x119   : > { %v417_v38 = vmul.f32 0.1, %v407_v35  ;;  %v423_v39 = vpack.c.bf16 %v420_v34, %v419_v36 }
 0x11a   : > { %v422_v40 = vmax.f32 %v412_v32, %v418_v37 }
 0x11b   : > { %v421_v41 = vmax.f32 %v407_v35, %v417_v38  ;;  %869 = vmatprep.mubr.bf16.mxu1 %v423_v39 }
 0x11d   : > { %v424_v42 = vpack.c.bf16 %v422_v40, %v421_v41 }
 0x11f   : > { %870 = vmatmul.mubr.bf16.vlgmr.msra.gmra.mrb[0].mxu1 %v424_v42 }
 0x1f2   : > { %v871_v47 = vpop.f32.mrb[0].mxu1 }
 0x1f3   : > { %v539_v48 = vadd.f32 %v871_v47, %v793_v46  ;;  %v530_v49 = vpop.f32.mrb[1].mxu1 }
 0x1f4   : > { %v531_v50 = vadd.f32 %v793_v46, %v530_v49  ;;  %v872_v51 = vpop.f32.mrb[2].mxu1 }
 0x1f5   : > { %v547_v52 = vmul.f32 0.1, %v539_v48  ;;  %v542_v53 = vadd.f32 %v872_v51, %v793_v46  ;;  %v533_v54 = vpop.f32.mrb[3].mxu1 }
 0x1f6   : > { %v545_v55 = vmul.f32 0.1, %v531_v50  ;;  %v534_v56 = vadd.f32 %v793_v46, %v533_v54 }
 0x1f7   : > { %v548_v57 = vmul.f32 0.1, %v542_v53  ;;  %v551_v59 = vmax.f32 %v539_v48, %v547_v52 }
 0x1f8   : > { %v546_v58 = vmul.f32 0.1, %v534_v56  ;;  %v549_v61 = vmax.f32 %v531_v50, %v545_v55 }
 0x1f9   : > { %v552_v60 = vmax.f32 %v542_v53, %v548_v57 }
 0x1fa   : > { %v550_v62 = vmax.f32 %v534_v56, %v546_v58 }
 0x1fb   : > { %v554_v63 = vpack.c.bf16 %v552_v60, %v551_v59 }
 0x1fc   : > { %v553_v0 = vpack.c.bf16 %v550_v62, %v549_v61 }
 0x1fe   : > { %889 = vmatprep.mubr.bf16.mxu0 %v553_v0 }
 0x1ff   : > { %890 = vmatmul.mubr.bf16.vlgmr.msra.gmra.mrb[4].mxu0 %v554_v63 }
 0x2d2   : > { %v891_v2 = vpop.f32.mrb[4].mxu0 }
 0x2d3   : > { %v669_v3 = vadd.f32 %v891_v2, %v802_v1  ;;  %v660_v4 = vpop.f32.mrb[5].mxu0 }
 0x2d4   : > { %v661_v5 = vadd.f32 %v802_v1, %v660_v4  ;;  %v892_v6 = vpop.f32.mrb[6].mxu0 }
 0x2d5   : > { %v677_v7 = vmul.f32 0.1, %v669_v3  ;;  %v672_v8 = vadd.f32 %v892_v6, %v802_v1  ;;  %v663_v9 = vpop.f32.mrb[7].mxu0 }
 0x2d6   : > { %v675_v10 = vmul.f32 0.1, %v661_v5  ;;  %v664_v11 = vadd.f32 %v802_v1, %v663_v9 }
 0x2d7   : > { %v681_v12 = vmax.f32 %v669_v3, %v677_v7  ;;  %v678_v13 = vmul.f32 0.1, %v672_v8 }
 0x2d8   : > { %v679_v14 = vmax.f32 %v661_v5, %v675_v10  ;;  %v676_v15 = vmul.f32 0.1, %v664_v11 }
 0x2d9   : > { %685 = vst [vmem:[%s287_s22 + $0x10] sm:$0xff] %v681_v12  ;;  %v682_v16 = vmax.f32 %v672_v8, %v678_v13 }
 0x2da   : > { %683 = vst [vmem:[%s287_s22] sm:$0xff] %v679_v14  ;;  %v680_v17 = vmax.f32 %v664_v11, %v676_v15 }
 0x2db   : > { %686 = vst [vmem:[%s287_s22 + $0x18] sm:$0xff] %v682_v16 }
 0x2dc   : > { %684 = vst [vmem:[%s287_s22 + $0x8] sm:$0xff] %v680_v17 }
 0x2dd   : > { %1008 = shalt.err (!%p1005_p7)
}
 0x2de   : > { %s1009_s19 = scalar_lea.hbm %s1246_s8, 512  ;;  %s1013_s21 = scalar_lea.hbm %s1296_s7, 1024 }
 0x2df   : > { %p1010_p8 = scmp.ne.s32.totalorder %s1246_s8, %s1009_s19  ;;  %p1014_p1 = scmp.lt.u32.totalorder %s1246_s8, %s1296_s7 }
 0x2e0   : > { %p1015_p0 = scmp.lt.u32.totalorder %s1013_s21, %s1009_s19  ;;  %p1017_p6 = scmp.lt.u32.totalorder %s1009_s19, %s1246_s8 }
 0x2e1   : > { %p1011_p11 = pnand %p1010_p8, %p1307_p9 }
 0x2e2   : > { %p1016_p5 = por %p1015_p0, %p1014_p1 }
 0x2e3   : > { %p1012_p13 = pneg %p1011_p11 }
 0x2e4   : > { %p1018_p10 = por %p1017_p6, %p1016_p5 }
 0x2e6   : > { %p1019_p12 = pnand %p1018_p10, %p1012_p13 }
 0x2e8   : > { %1022 = shalt.err (!%p1019_p12)
}
 0x2e9   : > { %s1067_s23 = smov 128   ;;  %s1068_s29 = smov 8  }
 0x2ea   : > { %901 = dma.vmem_to_hbm [thread:$0]  (%p1307_p9), %s1241_s15, 512, %s1246_s8, %s1248_s28, %s1067_s23, %s1067_s23, %s1068_s29  }
 0x2eb PF: > { %p913_p2 = scmp.ge.s32.totalorder %s1061_s27, 2  ;;  %s716_s9 = sand.u32 1, %s1049_s24  }
 0x2ec   : > { %p1308_p3 = scmp.ne.s32.totalorder %s1301_s12, 0  ;;  %s717_s14 = scalar_lea.sflag [#allocation4], %s716_s9 }
 0x2ee   : > { %p908_p4 = pnand %p913_p2, %p1308_p3 }
 0x2f0   : > { %1044 = dma.done.wait (!%p908_p4), %s717_s14, 512  }
 0x2f1   : > { %1046 = vsyncadd (!%p908_p4), %s717_s14, 4294966784  ;;  %p18_p7 = scmp.ge.s32.totalorder %s1134_s30, 4   ;;  %s1309_s24 = smov %s1053_s25 }
 0x2f2   : > { %s1310_s25 = smov %s1057_s26  ;;  %s1311_s26 = smov %s1145_s10 }
 0x2f3   : > { %s1312_s27 = smov %s1134_s30  ;;  %20 = sbr.rel (!%p18_p7) target bundleno = 4 (0x4), region = 88 }
 0x2fa   :  { %722 = vsyncpa [#allocation3], 1 }
 0x2fb   :  { %724 = vsyncpa [#allocation3 + $0x1], 1 }
 0x2fc   :  { %725 = vsyncpa [#allocation4], 1 }
 0x2fd   :  { %727 = vsyncpa [#allocation4 + $0x1], 1 }

</bundles_post_ra>
